<compile_context>
chip_gen: v5e
topology: v5e:2x2
jax: 0.10.0
libtpu: 0.0.40
codegen_flags: <defaults>
</compile_context>

<pallas_src>
import functools

import jax
import jax.numpy as jnp
from jax.experimental import pallas as pl
from jax.experimental.pallas import tpu as pltpu


# ---------------------------------------------------------------------------
# Kernel: fused Linear -> ReLU -> Linear -> LayerNorm for one row tile.
# ---------------------------------------------------------------------------
def node_cls_kernel(x_ref, w1_ref, b1_ref, w2_ref, b2_ref, g_ref, beta_ref,
                    o_ref, *, eps):
    # Linear1 + ReLU (intermediate (bm, h_dim) activation never leaves VMEM).
    h = jnp.dot(x_ref[...], w1_ref[...],
                preferred_element_type=jnp.float32) + b1_ref[...]
    h = jnp.maximum(h, 0.0)

    # Linear2.
    o = jnp.dot(h, w2_ref[...],
                preferred_element_type=jnp.float32) + b2_ref[...]

    # LayerNorm over the class dim (biased variance, eps=1e-5), with affine.
    mu = jnp.mean(o, axis=-1, keepdims=True)
    var = jnp.mean((o - mu) ** 2, axis=-1, keepdims=True)
    o = (o - mu) * jax.lax.rsqrt(var + eps)
    o_ref[...] = o * g_ref[...] + beta_ref[...]


# ---------------------------------------------------------------------------
# Wrapper
# ---------------------------------------------------------------------------
def _round_up(x, m):
    return ((x + m - 1) // m) * m


def node_cls_forward(x, w1, b1, w2, b2, ln_gamma, ln_beta,
                     *, eps=1e-5, block_rows=256):
    """Fused Node_Cls forward.

    x        : (N, in_dim)   float32 node features
    w1, b1   : (in_dim, h_dim), (h_dim,)
    w2, b2   : (h_dim, c_dim), (c_dim,)
    ln_gamma, ln_beta : (c_dim,)   LayerNorm affine params
    returns  : (N, c_dim)
    """
    n, in_dim = x.shape
    h_dim = w1.shape[1]
    c_dim = w2.shape[1]

    # Row tile: biggest of (block_rows, N rounded to sublane multiple). Keeps
    # weights + two row tiles well under any per-generation VMEM budget
    # (v7x 64 MiB included) while giving the DMA pipeline work at large N.
    bm = min(block_rows, _round_up(n, 8))
    grid = (pl.cdiv(n, bm),)

    # 2-D views so every operand is a plain (sublane, lane) tile.
    b1r = b1.reshape(1, h_dim)
    b2r = b2.reshape(1, c_dim)
    gr = ln_gamma.reshape(1, c_dim)
    br = ln_beta.reshape(1, c_dim)

    row_spec = pl.BlockSpec((bm, in_dim), lambda i: (i, 0))
    out_spec = pl.BlockSpec((bm, c_dim), lambda i: (i, 0))
    # Constant block index -> weights/biases are fetched once and stay
    # resident in VMEM across all row tiles.
    const = lambda shape: pl.BlockSpec(shape, lambda i: (0, 0))

    kern = functools.partial(node_cls_kernel, eps=eps)
    return pl.pallas_call(
        kern,
        grid=grid,
        in_specs=[row_spec,
                  const((in_dim, h_dim)), const((1, h_dim)),
                  const((h_dim, c_dim)), const((1, c_dim)),
                  const((1, c_dim)), const((1, c_dim))],
        out_specs=out_spec,
        out_shape=jax.ShapeDtypeStruct((n, c_dim), jnp.float32),
        compiler_params=pltpu.CompilerParams(
            dimension_semantics=("parallel",)),   # megacore / 2-TC friendly
    )(x, w1, b1r, w2, b2r, gr, br)


# ---------------------------------------------------------------------------
# Pure-JAX reference (mirrors the PyTorch module exactly).
# ---------------------------------------------------------------------------
def node_cls_reference(x, w1, b1, w2, b2, ln_gamma, ln_beta, eps=1e-5):
    h = jnp.maximum(x @ w1 + b1, 0.0)
    o = h @ w2 + b2
    mu = jnp.mean(o, axis=-1, keepdims=True)
    var = jnp.mean((o - mu) ** 2, axis=-1, keepdims=True)
    return (o - mu) * jax.lax.rsqrt(var + eps) * ln_gamma + ln_beta


# ---------------------------------------------------------------------------
# Param init (PyTorch nn.Linear default init; LayerNorm gamma=1, beta=0).
# ---------------------------------------------------------------------------
def linear_params(key, fan_in, fan_out):
    kw, kb = jax.random.split(key)
    bound = 1.0 / jnp.sqrt(jnp.float32(fan_in))
    w = jax.random.uniform(kw, (fan_in, fan_out), jnp.float32, -bound, bound)
    b = jax.random.uniform(kb, (fan_out,), jnp.float32, -bound, bound)
    return w, b


if __name__ == "__main__":
    N, IN_DIM, H_DIM, C_DIM = 16, 16, 32, 4

    key = jax.random.PRNGKey(0)
    k_x, k_l1, k_l2 = jax.random.split(key, 3)

    x = jax.random.normal(k_x, (N, IN_DIM), jnp.float32)
    w1, b1 = linear_params(k_l1, IN_DIM, H_DIM)
    w2, b2 = linear_params(k_l2, H_DIM, C_DIM)
    ln_gamma = jnp.ones((C_DIM,), jnp.float32)
    ln_beta = jnp.zeros((C_DIM,), jnp.float32)

    out = node_cls_forward(x, w1, b1, w2, b2, ln_gamma, ln_beta)
    out = jax.block_until_ready(out)

    ref = node_cls_reference(x, w1, b1, w2, b2, ln_gamma, ln_beta)
    assert out.shape == (N, C_DIM)
    assert bool(jnp.all(jnp.isfinite(out)))
    assert bool(jnp.allclose(out, ref, atol=1e-5, rtol=1e-5)), (
        float(jnp.max(jnp.abs(out - ref))))
    print("KERNEL_OK")
</pallas_src>

<mosaic_0001>
module attributes {stable_mosaic.version = 11 : i64} {
  func.func @node_cls_kernel(%arg0: i32, %arg1: memref<16x16xf32, #tpu.memory_space<vmem>>, %arg2: memref<16x32xf32, #tpu.memory_space<vmem>>, %arg3: memref<1x32xf32, #tpu.memory_space<vmem>>, %arg4: memref<32x4xf32, #tpu.memory_space<vmem>>, %arg5: memref<1x4xf32, #tpu.memory_space<vmem>>, %arg6: memref<1x4xf32, #tpu.memory_space<vmem>>, %arg7: memref<1x4xf32, #tpu.memory_space<vmem>>, %arg8: memref<16x4xf32, #tpu.memory_space<vmem>>) attributes {dimension_semantics = [#tpu.dimension_semantics<parallel>], iteration_bounds = array<i64: 1>, scalar_prefetch = 0 : i64, scratch_operands = 0 : i64, tpu.core_type = #tpu.core_type<tc>, window_params = [{transform_indices = @transform_0, window_bounds = array<i64: 16, 16>}, {pipeline_mode = #tpu.pipeline_mode<synchronous>, transform_indices = @transform_1, window_bounds = array<i64: 16, 32>}, {pipeline_mode = #tpu.pipeline_mode<synchronous>, transform_indices = @transform_2, window_bounds = array<i64: 1, 32>}, {pipeline_mode = #tpu.pipeline_mode<synchronous>, transform_indices = @transform_3, window_bounds = array<i64: 32, 4>}, {pipeline_mode = #tpu.pipeline_mode<synchronous>, transform_indices = @transform_4, window_bounds = array<i64: 1, 4>}, {pipeline_mode = #tpu.pipeline_mode<synchronous>, transform_indices = @transform_5, window_bounds = array<i64: 1, 4>}, {pipeline_mode = #tpu.pipeline_mode<synchronous>, transform_indices = @transform_6, window_bounds = array<i64: 1, 4>}, {transform_indices = @transform_7, window_bounds = array<i64: 16, 4>}]} {
    %c0 = arith.constant 0 : index
    %c0_0 = arith.constant 0 : index
    %0 = vector.load %arg1[%c0, %c0_0] : memref<16x16xf32, #tpu.memory_space<vmem>>, vector<16x16xf32>
    %c0_1 = arith.constant 0 : index
    %c0_2 = arith.constant 0 : index
    %1 = vector.load %arg2[%c0_1, %c0_2] : memref<16x32xf32, #tpu.memory_space<vmem>>, vector<16x32xf32>
    %cst = arith.constant dense<0.000000e+00> : vector<16x32xf32>
    %2 = tpu.matmul %0, %1, %cst {dimension_numbers = #tpu.dot_dimension_numbers<[1], [0], [0], [1], [0, 0, 1, 1], [], []>} : vector<16x16xf32>, vector<16x32xf32>, vector<16x32xf32> -> vector<16x32xf32>
    %c0_3 = arith.constant 0 : index
    %c0_4 = arith.constant 0 : index
    %3 = vector.load %arg3[%c0_3, %c0_4] : memref<1x32xf32, #tpu.memory_space<vmem>>, vector<1x32xf32>
    %4 = vector.broadcast %3 : vector<1x32xf32> to vector<16x32xf32>
    %5 = arith.addf %2, %4 : vector<16x32xf32>
    %cst_5 = arith.constant 0.000000e+00 : f32
    %6 = vector.broadcast %cst_5 : f32 to vector<16x32xf32>
    %7 = arith.maximumf %5, %6 : vector<16x32xf32>
    %c0_6 = arith.constant 0 : index
    %c0_7 = arith.constant 0 : index
    %8 = vector.load %arg4[%c0_6, %c0_7] : memref<32x4xf32, #tpu.memory_space<vmem>>, vector<32x4xf32>
    %cst_8 = arith.constant dense<0.000000e+00> : vector<16x4xf32>
    %9 = tpu.matmul %7, %8, %cst_8 {dimension_numbers = #tpu.dot_dimension_numbers<[1], [0], [0], [1], [0, 0, 1, 1], [], []>} : vector<16x32xf32>, vector<32x4xf32>, vector<16x4xf32> -> vector<16x4xf32>
    %c0_9 = arith.constant 0 : index
    %c0_10 = arith.constant 0 : index
    %10 = vector.load %arg5[%c0_9, %c0_10] : memref<1x4xf32, #tpu.memory_space<vmem>>, vector<1x4xf32>
    %11 = vector.broadcast %10 : vector<1x4xf32> to vector<16x4xf32>
    %12 = arith.addf %9, %11 : vector<16x4xf32>
    %cst_11 = arith.constant dense<0.000000e+00> : vector<16xf32>
    %13 = vector.multi_reduction <add>, %12, %cst_11 [1] : vector<16x4xf32> to vector<16xf32>
    %14 = vector.shape_cast %13 : vector<16xf32> to vector<16x1xf32>
    %cst_12 = arith.constant 4.000000e+00 : f32
    %15 = vector.broadcast %cst_12 : f32 to vector<16x1xf32>
    %16 = arith.divf %14, %15 : vector<16x1xf32>
    %17 = vector.broadcast %16 : vector<16x1xf32> to vector<16x4xf32>
    %18 = arith.subf %12, %17 : vector<16x4xf32>
    %19 = arith.mulf %18, %18 : vector<16x4xf32>
    %cst_13 = arith.constant dense<0.000000e+00> : vector<16xf32>
    %20 = vector.multi_reduction <add>, %19, %cst_13 [1] : vector<16x4xf32> to vector<16xf32>
    %21 = vector.shape_cast %20 : vector<16xf32> to vector<16x1xf32>
    %cst_14 = arith.constant 4.000000e+00 : f32
    %22 = vector.broadcast %cst_14 : f32 to vector<16x1xf32>
    %23 = arith.divf %21, %22 : vector<16x1xf32>
    %24 = vector.broadcast %16 : vector<16x1xf32> to vector<16x4xf32>
    %25 = arith.subf %12, %24 : vector<16x4xf32>
    %cst_15 = arith.constant 9.99999974E-6 : f32
    %26 = vector.broadcast %cst_15 : f32 to vector<16x1xf32>
    %27 = arith.addf %23, %26 : vector<16x1xf32>
    %28 = math.rsqrt %27 : vector<16x1xf32>
    %29 = vector.broadcast %28 : vector<16x1xf32> to vector<16x4xf32>
    %30 = arith.mulf %25, %29 : vector<16x4xf32>
    %c0_16 = arith.constant 0 : index
    %c0_17 = arith.constant 0 : index
    %31 = vector.load %arg6[%c0_16, %c0_17] : memref<1x4xf32, #tpu.memory_space<vmem>>, vector<1x4xf32>
    %32 = vector.broadcast %31 : vector<1x4xf32> to vector<16x4xf32>
    %33 = arith.mulf %30, %32 : vector<16x4xf32>
    %c0_18 = arith.constant 0 : index
    %c0_19 = arith.constant 0 : index
    %34 = vector.load %arg7[%c0_18, %c0_19] : memref<1x4xf32, #tpu.memory_space<vmem>>, vector<1x4xf32>
    %35 = vector.broadcast %34 : vector<1x4xf32> to vector<16x4xf32>
    %36 = arith.addf %33, %35 : vector<16x4xf32>
    %c0_20 = arith.constant 0 : index
    %c0_21 = arith.constant 0 : index
    %37 = vector.load %arg8[%c0_20, %c0_21] : memref<16x4xf32, #tpu.memory_space<vmem>>, vector<16x4xf32>
    tpu.vector_store %arg8[%c0_20, %c0_21], %36 {strides = array<i32>} : memref<16x4xf32, #tpu.memory_space<vmem>>, vector<16x4xf32>,
    return
  }
  func.func @transform_0(%arg0: i32) -> (i32, i32) {
    %c0_i32 = arith.constant 0 : i32
    %c0_i32_0 = arith.constant 0 : i32
    return %arg0, %c0_i32 : i32, i32
  }
  func.func @transform_1(%arg0: i32) -> (i32, i32) {
    %c0_i32 = arith.constant 0 : i32
    %c0_i32_0 = arith.constant 0 : i32
    %c0_i32_1 = arith.constant 0 : i32
    return %c0_i32, %c0_i32_0 : i32, i32
  }
  func.func @transform_2(%arg0: i32) -> (i32, i32) {
    %c0_i32 = arith.constant 0 : i32
    %c0_i32_0 = arith.constant 0 : i32
    %c0_i32_1 = arith.constant 0 : i32
    return %c0_i32, %c0_i32_0 : i32, i32
  }
  func.func @transform_3(%arg0: i32) -> (i32, i32) {
    %c0_i32 = arith.constant 0 : i32
    %c0_i32_0 = arith.constant 0 : i32
    %c0_i32_1 = arith.constant 0 : i32
    return %c0_i32, %c0_i32_0 : i32, i32
  }
  func.func @transform_4(%arg0: i32) -> (i32, i32) {
    %c0_i32 = arith.constant 0 : i32
    %c0_i32_0 = arith.constant 0 : i32
    %c0_i32_1 = arith.constant 0 : i32
    return %c0_i32, %c0_i32_0 : i32, i32
  }
  func.func @transform_5(%arg0: i32) -> (i32, i32) {
    %c0_i32 = arith.constant 0 : i32
    %c0_i32_0 = arith.constant 0 : i32
    %c0_i32_1 = arith.constant 0 : i32
    return %c0_i32, %c0_i32_0 : i32, i32
  }
  func.func @transform_6(%arg0: i32) -> (i32, i32) {
    %c0_i32 = arith.constant 0 : i32
    %c0_i32_0 = arith.constant 0 : i32
    %c0_i32_1 = arith.constant 0 : i32
    return %c0_i32, %c0_i32_0 : i32, i32
  }
  func.func @transform_7(%arg0: i32) -> (i32, i32) {
    %c0_i32 = arith.constant 0 : i32
    %c0_i32_0 = arith.constant 0 : i32
    return %arg0, %c0_i32 : i32, i32
  }
}

</mosaic_0001>

<bundles_post_ra>
// kernel: tpu_custom_call.1
= control target key start
LH: loop header
LB: loop body
LE: loop exit
PB: predicated region body
PF: predicated region fallthrough
CT: control target
= control target key end

     0   :  { %vm34_vm0 = vcmask 130048   ;;  %vm74_vm1 = vcmask 261120   ;;  %vm104_vm2 = vcmask 31744   ;;  %v195_v22 = vmov 4.0   ;;  %s284_s1 = inlined_call_operand.vmem [shape: f32[16,32], index: 1, kind: input, shape index: {}]   ;;  %s285_s0 = inlined_call_operand.vmem [shape: f32[16,16], index: 0, kind: input, shape index: {}]   ;;  %s286_s3 = inlined_call_operand.vmem [shape: f32[32,4], index: 3, kind: input, shape index: {}]   ;;  %s287_s2 = inlined_call_operand.vmem [shape: f32[1,32], index: 2, kind: input, shape index: {}]   ;;  %s288_s4 = inlined_call_operand.vmem [shape: f32[1,4], index: 4, kind: input, shape index: {}]   ;;  %s289_s5 = inlined_call_operand.vmem [shape: f32[1,4], index: 5, kind: input, shape index: {}]   ;;  %s290_s6 = inlined_call_operand.vmem [shape: f32[1,4], index: 6, kind: input, shape index: {}]   ;;  %s291_s7 = inlined_call_operand.vmem [shape: f32[16,4], index: 7, kind: output, shape index: {}]  }
   0x1   :  { %v29_v0 = vld [vmem:[%s284_s1 + $0x8] sm:$0xff]  ;;  %v28_v1 = vld [vmem:[%s284_s1] sm:$0xff]  ;;  %v69_v4 = vld [vmem:[%s286_s3 + $0x18] sm:$0xff]  ;;  %189 = vrcp.f32 %v195_v22 }
   0x2   :  { %v26_v2 = vld [vmem:[%s285_s0] sm:$0xff]  ;;  %55 = vmatpush.msra.mxu0 %v29_v0  ;;  %178 = vmatpush.msra.mxu3 %v29_v0  ;;  %v27_v3 = vld [vmem:[%s285_s0 + $0x8] sm:$0xff]  ;;  %v68_v5 = vld [vmem:[%s286_s3 + $0x10] sm:$0xff] }
   0x3   :  { %93 = vmatpush.msra.mxu1 %v69_v4  ;;  %180 = vmatpush.msra.mxu2 %v69_v4  ;;  %v67_v6 = vld [vmem:[%s286_s3 + $0x8] sm:$0xff]  ;;  %v66_v7 = vld [vmem:[%s286_s3] sm:$0xff] }
   0x4   :  { %56 = vmatpush.msra.mxu0 %v28_v1  ;;  %179 = vmatpush.msra.mxu3 %v28_v1  ;;  %v185_v8 = vld [vmem:[%s287_s2] ss:$0 sm:$0xff] }
   0x5   :  { %174 = vmatmul.msk.f32.vlgmr.msra.gmra.mxu0 %vm34_vm0, %v26_v2  ;;  %175 = vmatmul.msk.f32.vlgmr.msra.gmra.mxu3 %vm34_vm0, %v27_v3  ;;  %v186_v15 = vld [vmem:[%s288_s4] ss:$0 sm:$0xff] }
   0x6   :  { %94 = vmatpush.msra.mxu1 %v68_v5  ;;  %181 = vmatpush.msra.mxu2 %v68_v5  ;;  %v187_v51 = vld [vmem:[%s289_s5] ss:$0 sm:$0xff] }
   0x7   :  { %v190_v23 = vpop.eup %189  ;;  %v188_v54 = vld [vmem:[%s290_s6] ss:$0 sm:$0xff] }
   0x8   :  { %95 = vmatpush.msra.mxu1 %v67_v6  ;;  %182 = vmatpush.msra.mxu2 %v67_v6  ;;  %v112_v24 = vmul.f32 4.0, %v190_v23  ;;  %vm116_vm3 = vweird.f32 %v190_v23 }
   0xa   :  { %96 = vmatpush.msra.mxu1 %v66_v7  ;;  %183 = vmatpush.msra.mxu2 %v66_v7  ;;  %v113_v25 = vsub.f32 1.0, %v112_v24 }
   0xc   :  { %v114_v26 = vmul.f32 %v190_v23, %v113_v25 }
   0xe   :  { %v115_v27 = vadd.f32 %v190_v23, %v114_v26 }
  0x10   :  { %v117_v28 = vsel %vm116_vm3, %v190_v23, %v115_v27 }
  0x82   :  { %v58_v9 = vpop.f32.mrf.mxu0 }
  0x83   :  { %v59_v10 = vadd.f32 %v185_v8, %v58_v9 }
  0x85   :  { %v64_v11 = vmax.f32 %v59_v10, 0.0 }
  0x87   :  { %176 = vmatmul.msk.f32.vlgmr.msra.gmra.mxu1 %vm74_vm1, %v64_v11 }
  0x88   :  { %v61_v12 = vpop.f32.mrf.mxu3 }
  0x89   :  { %v62_v13 = vadd.f32 %v185_v8, %v61_v12 }
  0x8b   :  { %v65_v14 = vmax.f32 %v62_v13, 0.0 }
  0x8d   :  { %177 = vmatmul.msk.f32.vlgmr.msra.gmra.mxu2 %vm74_vm1, %v65_v14 }
 0x104   :  { %v98_v16 = vpop.f32.mrf.mxu1 }
 0x105   :  { %v99_v17 = vadd.f32 %v186_v15, %v98_v16 }
 0x107   :  { %v105_v18 = vsel %vm104_vm2, %v99_v17, 0.0 }
 0x108   :  { %106 = vadd.xlane.f32.xlu0 %v105_v18 }
 0x110   :  { %v101_v19 = vpop.f32.mrf.mxu2 }
 0x111   :  { %v102_v20 = vadd.f32 %v186_v15, %v101_v19 }
 0x113   :  { %v108_v21 = vsel %vm104_vm2, %v102_v20, 0.0 }
 0x114   :  { %109 = vadd.xlane.f32.xlu0 %v108_v21 }
 0x17b   :  { %v107_v29 = vpop.xlane.xlu0 %106 }
 0x17c   :  { %v118_v30 = vmul.f32 %v117_v28, %v107_v29 }
 0x17e   :  { %v120_v31 = vsub.f32 %v99_v17, %v118_v30 }
 0x180   :  { %v122_v32 = vmul.f32 %v120_v31, %v120_v31 }
 0x182   :  { %v124_v33 = vsel %vm104_vm2, %v122_v32, 0.0 }
 0x183   :  { %125 = vadd.xlane.f32.xlu1 %v124_v33 }
 0x187   :  { %v110_v34 = vpop.xlane.xlu0 %109 }
 0x188   :  { %v119_v35 = vmul.f32 %v117_v28, %v110_v34 }
 0x18a   :  { %v121_v36 = vsub.f32 %v102_v20, %v119_v35 }
 0x18c   :  { %v123_v37 = vmul.f32 %v121_v36, %v121_v36 }
 0x18e   :  { %v127_v38 = vsel %vm104_vm2, %v123_v37, 0.0 }
 0x18f   :  { %128 = vadd.xlane.f32.xlu1 %v127_v38 }
 0x1f6   :  { %v126_v39 = vpop.xlane.xlu1 %125 }
 0x1f7   :  { %v130_v40 = vmul.f32 %v126_v39, %v117_v28 }
 0x1f9   :  { %v132_v41 = vadd.f32 1e-05, %v130_v40 }
 0x1fb   :  { %191 = vrsqrt.f32 %v132_v41  ;;  %vm140_vm5 = vweird.f32 %v132_v41 }
 0x201   :  { %v192_v42 = vpop.eup %191 }
 0x202   :  { %v135_v43 = vmul.f32 %v192_v42, %v132_v41  ;;  %v129_v44 = vpop.xlane.xlu1 %128  ;;  %vm141_vm4 = vweird.f32 %v192_v42 }
 0x203   :  { %v131_v45 = vmul.f32 %v129_v44, %v117_v28  ;;  %vm142_vm6 = vmor %vm140_vm5, %vm141_vm4 }
 0x204   :  { %v136_v46 = vmul.f32 %v192_v42, %v135_v43 }
 0x205   :  { %v133_v47 = vadd.f32 1e-05, %v131_v45 }
 0x206   :  { %v137_v48 = vmul.f32 0.5, %v136_v46 }
 0x207   :  { %193 = vrsqrt.f32 %v133_v47  ;;  %vm150_vm8 = vweird.f32 %v133_v47 }
 0x208   :  { %v138_v49 = vsub.f32 1.5, %v137_v48 }
 0x20a   :  { %v139_v50 = vmul.f32 %v192_v42, %v138_v49 }
 0x20c   :  { %v143_v52 = vsel %vm142_vm6, %v192_v42, %v139_v50 }
 0x20d   :  { %v194_v53 = vpop.eup %193  ;;  %v154_v55 = vmul.f32 %v143_v52, %v120_v31 }
 0x20e   :  { %v145_v56 = vmul.f32 %v194_v53, %v133_v47  ;;  %vm151_vm7 = vweird.f32 %v194_v53 }
 0x20f   :  { %v160_v57 = vmul.f32 %v187_v51, %v154_v55  ;;  %vm152_vm9 = vmor %vm150_vm8, %vm151_vm7 }
 0x210   :  { %v146_v58 = vmul.f32 %v194_v53, %v145_v56 }
 0x211   :  { %v166_v59 = vadd.f32 %v188_v54, %v160_v57 }
 0x212   :  { %v147_v60 = vmul.f32 0.5, %v146_v58 }
 0x213   :  { %168 = vst.msk [vmem:[%s291_s7] sm:$0xff] %vm104_vm2, %v166_v59 }
 0x214   :  { %v148_v61 = vsub.f32 1.5, %v147_v60 }
 0x216   :  { %v149_v62 = vmul.f32 %v194_v53, %v148_v61 }
 0x218   :  { %v153_v63 = vsel %vm152_vm9, %v194_v53, %v149_v62 }
 0x219   :  { %v155_v0 = vmul.f32 %v153_v63, %v121_v36 }
 0x21b   :  { %v161_v1 = vmul.f32 %v187_v51, %v155_v0 }
 0x21d   :  { %v167_v2 = vadd.f32 %v188_v54, %v161_v1 }
 0x21f   :  { %169 = vst.msk [vmem:[%s291_s7 + $0x8] sm:$0xff] %vm104_vm2, %v167_v2 }

</bundles_post_ra>
